<compile_context>
chip_gen: v6e
topology: v6e:2x2x1
jax: 0.10.0
libtpu: 0.0.40
codegen_flags: <defaults>
</compile_context>

<pallas_src>
import functools

import jax
import jax.numpy as jnp
from jax import lax
from jax.experimental import pallas as pl
from jax.experimental.pallas import tpu as pltpu

# ---- module hyperparameters (match the PyTorch module) ----
N_EMBD = 32          # n_embd
NUM_HEADS = 4
HEAD_SIZE = 8        # head_size ; NUM_HEADS * HEAD_SIZE == N_EMBD
BLOCK_SIZE = 256     # only used for the causal mask; T <= BLOCK_SIZE


def _pick_tq(T):
    """Query-chunk rows: prefer 64 (fewer live score-tile vregs, finer causal
    pruning), then 128; fall back to a single chunk if T isn't a multiple."""
    for cand in (64, 128):
        if T > cand and T % cand == 0:
            return cand
    return T


def mha_kernel(x_ref, wqkv_ref, bproj_ref, o_ref, *, num_heads, head_size):
    """bblk batch elements per grid step: causal multi-head attention with the
    softmax scale and the output projection pre-folded into the packed weights."""
    bblk, T, C = x_ref.shape
    HHS = num_heads * head_size
    in_dtype = x_ref.dtype
    # bf16 operands are native on every MXU generation; f32 inputs stay f32.
    mxu_dtype = jnp.bfloat16 if in_dtype == jnp.bfloat16 else jnp.float32

    wqkv = wqkv_ref[...]                           # (C, Wpad): [Q*scale | K | V' | 0-pad]
    bias = bproj_ref[...].astype(jnp.float32)      # (1, C)

    TQ = _pick_tq(T)
    n_chunks = T // TQ

    # Hoisted batch-invariant values (computed once per grid step and captured
    # by the fori_loop body): bias broadcast + per-chunk causal masks.
    bias_bcast = jnp.broadcast_to(bias, (TQ, C))
    causal_masks = []
    for ci in range(n_chunks):
        q0 = ci * TQ
        kv_len = q0 + TQ                           # causal key-range pruning
        row = q0 + lax.broadcasted_iota(jnp.int32, (TQ, kv_len), 0)
        col = lax.broadcasted_iota(jnp.int32, (TQ, kv_len), 1)
        causal_masks.append(row >= col)

    def batch_body(b, carry):
        x = x_ref[b]                               # (T, C)

        # Fused projection for all heads: one wide MXU push.
        # Q columns are pre-scaled by 1/sqrt(hs); V' columns include Wproj.
        qkv = jnp.dot(x, wqkv, preferred_element_type=jnp.float32)   # (T, Wpad)

        # Per-head column slices hoisted out of the query-chunk loop
        # (lane selection happens once per head per batch element).
        q_heads = [qkv[:, h * head_size:(h + 1) * head_size].astype(mxu_dtype)
                   for h in range(num_heads)]
        k_heads = [qkv[:, HHS + h * head_size:HHS + (h + 1) * head_size].astype(mxu_dtype)
                   for h in range(num_heads)]
        v_heads = [qkv[:, 2 * HHS + h * C:2 * HHS + (h + 1) * C].astype(mxu_dtype)
                   for h in range(num_heads)]

        for ci in range(n_chunks):                 # static unroll (<= 4 chunks)
            q0 = ci * TQ
            kv_len = q0 + TQ                       # keys [0, q0+TQ) only
            causal = causal_masks[ci]

            acc = bias_bcast                       # (TQ, C) f32 accumulator
            for h in range(num_heads):             # static unroll
                q = q_heads[h][q0:q0 + TQ]         # (TQ, hs), already scaled
                k = k_heads[h][:kv_len]            # (kv_len, hs)
                v = v_heads[h][:kv_len]            # (kv_len, C), Wproj folded in

                # scores: q @ k^T (contract last dims; no explicit transpose)
                s = lax.dot_general(q, k, (((1,), (1,)), ((), ())),
                                    preferred_element_type=jnp.float32)  # (TQ, kv_len)
                s = jnp.where(causal, s, -jnp.inf)

                # row-wise softmax (diagonal always kept -> no NaN path)
                m = jnp.max(s, axis=-1, keepdims=True)
                p = jnp.exp(s - m)
                denom = jnp.sum(p, axis=-1, keepdims=True)
                p = p * pl.reciprocal(denom, approx=True)                # EUP vrcp

                # PV with the output projection already folded into v
                acc = acc + jnp.dot(p.astype(mxu_dtype), v,
                                    preferred_element_type=jnp.float32)  # (TQ, C)

            o_ref[b, q0:q0 + TQ, :] = acc.astype(o_ref.dtype)
        return carry

    lax.fori_loop(0, bblk, batch_body, 0)


def _pick_bblk(B):
    """Batch elements per grid step: largest divisor of B (cap 16) that keeps
    >= 2 grid steps (pipelining + work for both v7x TensorCores), preferring an
    even step count so the two cores stay balanced."""
    if B < 2:
        return 1
    cands = [c for c in range(1, min(B, 16) + 1) if B % c == 0 and B // c >= 2]
    if not cands:
        return B
    even = [c for c in cands if (B // c) % 2 == 0]
    return max(even) if even else max(cands)


@jax.jit
def multi_head_attention(x, wq, wk, wv, wproj, bproj):
    """
    x:        (B, T, C)
    wq/wk/wv: (H, hs, C)   per-head PyTorch Linear weights (no bias)
    wproj:    (C, H*hs)    PyTorch proj.weight layout
    bproj:    (C,)         proj.bias
    """
    B, T, C = x.shape
    H, hs, _ = wq.shape
    HHS = H * hs
    scale = hs ** -0.5

    # Wrapper-side packing (cheap ops traced outside the kernel):
    #   Q block pre-scaled by 1/sqrt(hs); K block; V' block = Wv_h^T @ Wproj_h
    #   per head (output projection folded in, exact by associativity);
    #   lane width zero-padded to a multiple of 128.
    wq_t = (wq * scale).reshape(HHS, C).T                      # (C, HHS)
    wk_t = wk.reshape(HHS, C).T                                # (C, HHS)
    wv_t = wv.reshape(HHS, C).T                                # (C, HHS)
    wproj_t = wproj.T                                          # (HHS, C)
    wvp = jnp.concatenate(
        [wv_t[:, h * hs:(h + 1) * hs] @ wproj_t[h * hs:(h + 1) * hs, :]
         for h in range(H)], axis=1)                           # (C, H*C)
    wqkv = jnp.concatenate([wq_t, wk_t, wvp], axis=1)          # (C, 2*HHS + H*C)
    pad = (-wqkv.shape[1]) % 128
    if pad:
        wqkv = jnp.pad(wqkv, ((0, 0), (0, pad)))
    wpad = wqkv.shape[1]

    bias2d = bproj.reshape(1, C)

    bblk = _pick_bblk(B)
    grid = (B // bblk,)

    kernel = functools.partial(mha_kernel, num_heads=H, head_size=hs)

    return pl.pallas_call(
        kernel,
        out_shape=jax.ShapeDtypeStruct((B, T, C), x.dtype),
        grid_spec=pltpu.PrefetchScalarGridSpec(
            num_scalar_prefetch=0,
            grid=grid,
            in_specs=[
                pl.BlockSpec((bblk, T, C), lambda i: (i, 0, 0)),   # x
                pl.BlockSpec((C, wpad), lambda i: (0, 0)),         # packed Wqkv' (scaled, proj-folded)
                pl.BlockSpec((1, C), lambda i: (0, 0)),            # proj bias
            ],
            out_specs=pl.BlockSpec((bblk, T, C), lambda i: (i, 0, 0)),
        ),
        compiler_params=pltpu.CompilerParams(
            dimension_semantics=("parallel",)),
    )(x, wqkv, bias2d)


def reference_mha(x, wq, wk, wv, wproj, bproj):
    """Pure-JAX reference matching the PyTorch forward (dropout = identity)."""
    B, T, C = x.shape
    H, hs, _ = wq.shape
    mask = jnp.tril(jnp.ones((T, T), dtype=bool))
    outs = []
    for h in range(H):
        q = x @ wq[h].T
        k = x @ wk[h].T
        v = x @ wv[h].T
        s = (q @ jnp.swapaxes(k, -2, -1)) * (hs ** -0.5)
        s = jnp.where(mask, s, -jnp.inf)
        p = jax.nn.softmax(s, axis=-1)
        outs.append(p @ v)
    cat = jnp.concatenate(outs, axis=-1)
    return cat @ wproj.T + bproj


def _make_params(key, dtype=jnp.float32):
    kq, kk, kv, kp, kb = jax.random.split(key, 5)
    lim_in = 1.0 / (N_EMBD ** 0.5)
    wq = jax.random.uniform(kq, (NUM_HEADS, HEAD_SIZE, N_EMBD),
                            minval=-lim_in, maxval=lim_in, dtype=dtype)
    wk = jax.random.uniform(kk, (NUM_HEADS, HEAD_SIZE, N_EMBD),
                            minval=-lim_in, maxval=lim_in, dtype=dtype)
    wv = jax.random.uniform(kv, (NUM_HEADS, HEAD_SIZE, N_EMBD),
                            minval=-lim_in, maxval=lim_in, dtype=dtype)
    lim_proj = 1.0 / ((NUM_HEADS * HEAD_SIZE) ** 0.5)
    wproj = jax.random.uniform(kp, (N_EMBD, NUM_HEADS * HEAD_SIZE),
                               minval=-lim_proj, maxval=lim_proj, dtype=dtype)
    bproj = jax.random.uniform(kb, (N_EMBD,),
                               minval=-lim_proj, maxval=lim_proj, dtype=dtype)
    return wq, wk, wv, wproj, bproj


if __name__ == "__main__":
    key = jax.random.PRNGKey(0)
    kparams, kx1, kx2 = jax.random.split(key, 3)
    wq, wk, wv, wproj, bproj = _make_params(kparams)

    # Primary small config (T <= 64 -> single query chunk).
    B, T = 2, 8
    x = jax.random.normal(kx1, (B, T, N_EMBD), dtype=jnp.float32)
    out = jax.block_until_ready(multi_head_attention(x, wq, wk, wv, wproj, bproj))
    ref = reference_mha(x, wq, wk, wv, wproj, bproj)
    assert out.shape == (B, T, N_EMBD), out.shape
    max_err = float(jnp.max(jnp.abs(out - ref)))
    # tolerance loosened slightly for pl.reciprocal(approx=True) + folded weights
    assert jnp.allclose(out, ref, atol=5e-3, rtol=5e-3), max_err

    # Second config exercising query chunking, causal key-range pruning and the
    # fori_loop batch unroll (T=128 -> TQ=64, 2 chunks; B=4 -> bblk=2, 2 steps).
    B2, T2 = 4, 128
    x2 = jax.random.normal(kx2, (B2, T2, N_EMBD), dtype=jnp.float32)
    out2 = jax.block_until_ready(multi_head_attention(x2, wq, wk, wv, wproj, bproj))
    ref2 = reference_mha(x2, wq, wk, wv, wproj, bproj)
    max_err2 = float(jnp.max(jnp.abs(out2 - ref2)))
    assert jnp.allclose(out2, ref2, atol=5e-3, rtol=5e-3), max_err2

    print("KERNEL_OK")
</pallas_src>

<mosaic_0001>
module attributes {stable_mosaic.version = 11 : i64} {
  func.func @mha_kernel(%arg0: i32, %arg1: memref<1x8x32xf32, #tpu.memory_space<vmem>>, %arg2: memref<32x256xf32, #tpu.memory_space<vmem>>, %arg3: memref<1x32xf32, #tpu.memory_space<vmem>>, %arg4: memref<1x8x32xf32, #tpu.memory_space<vmem>>) attributes {dimension_semantics = [#tpu.dimension_semantics<parallel>], iteration_bounds = array<i64: 2>, scalar_prefetch = 0 : i64, scratch_operands = 0 : i64, tpu.core_type = #tpu.core_type<tc>, window_params = [{transform_indices = @transform_0, window_bounds = array<i64: 1, 8, 32>}, {pipeline_mode = #tpu.pipeline_mode<synchronous>, transform_indices = @transform_1, window_bounds = array<i64: 32, 256>}, {pipeline_mode = #tpu.pipeline_mode<synchronous>, transform_indices = @transform_2, window_bounds = array<i64: 1, 32>}, {transform_indices = @transform_3, window_bounds = array<i64: 1, 8, 32>}]} {
    %c0 = arith.constant 0 : index
    %c0_0 = arith.constant 0 : index
    %0 = vector.load %arg2[%c0, %c0_0] : memref<32x256xf32, #tpu.memory_space<vmem>>, vector<32x256xf32>
    %c0_1 = arith.constant 0 : index
    %c0_2 = arith.constant 0 : index
    %1 = vector.load %arg3[%c0_1, %c0_2] : memref<1x32xf32, #tpu.memory_space<vmem>>, vector<1x32xf32>
    %2 = vector.shape_cast %1 : vector<1x32xf32> to vector<1x32xf32>
    %3 = vector.broadcast %2 : vector<1x32xf32> to vector<8x32xf32>
    %4 = tpu.iota {dimensions = array<i32: 0>} : vector<8x8xi32>
    %c0_i32 = arith.constant 0 : i32
    %5 = vector.broadcast %c0_i32 : i32 to vector<8x8xi32>
    %6 = arith.addi %5, %4 : vector<8x8xi32>
    %7 = tpu.iota {dimensions = array<i32: 1>} : vector<8x8xi32>
    %8 = arith.cmpi sge, %6, %7 : vector<8x8xi32>
    %c0_i32_3 = arith.constant 0 : i32
    %9 = arith.index_cast %c0_i32_3 : i32 to index
    %c0_4 = arith.constant 0 : index
    %c0_5 = arith.constant 0 : index
    %10 = vector.load %arg1[%9, %c0_4, %c0_5] : memref<1x8x32xf32, #tpu.memory_space<vmem>>, vector<1x8x32xf32>
    %11 = vector.shape_cast %10 : vector<1x8x32xf32> to vector<8x32xf32>
    %cst = arith.constant dense<0.000000e+00> : vector<8x256xf32>
    %12 = tpu.matmul %11, %0, %cst {dimension_numbers = #tpu.dot_dimension_numbers<[1], [0], [0], [1], [0, 0, 1, 1], [], []>} : vector<8x32xf32>, vector<32x256xf32>, vector<8x256xf32> -> vector<8x256xf32>
    %13 = vector.extract_strided_slice %12 {offsets = [0, 0], sizes = [8, 8], strides = [1, 1]} : vector<8x256xf32> to vector<8x8xf32>
    %14 = vector.extract_strided_slice %12 {offsets = [0, 8], sizes = [8, 8], strides = [1, 1]} : vector<8x256xf32> to vector<8x8xf32>
    %15 = vector.extract_strided_slice %12 {offsets = [0, 16], sizes = [8, 8], strides = [1, 1]} : vector<8x256xf32> to vector<8x8xf32>
    %16 = vector.extract_strided_slice %12 {offsets = [0, 24], sizes = [8, 8], strides = [1, 1]} : vector<8x256xf32> to vector<8x8xf32>
    %17 = vector.extract_strided_slice %12 {offsets = [0, 32], sizes = [8, 8], strides = [1, 1]} : vector<8x256xf32> to vector<8x8xf32>
    %18 = vector.extract_strided_slice %12 {offsets = [0, 40], sizes = [8, 8], strides = [1, 1]} : vector<8x256xf32> to vector<8x8xf32>
    %19 = vector.extract_strided_slice %12 {offsets = [0, 48], sizes = [8, 8], strides = [1, 1]} : vector<8x256xf32> to vector<8x8xf32>
    %20 = vector.extract_strided_slice %12 {offsets = [0, 56], sizes = [8, 8], strides = [1, 1]} : vector<8x256xf32> to vector<8x8xf32>
    %21 = vector.extract_strided_slice %12 {offsets = [0, 64], sizes = [8, 32], strides = [1, 1]} : vector<8x256xf32> to vector<8x32xf32>
    %22 = vector.extract_strided_slice %12 {offsets = [0, 96], sizes = [8, 32], strides = [1, 1]} : vector<8x256xf32> to vector<8x32xf32>
    %23 = vector.extract_strided_slice %12 {offsets = [0, 128], sizes = [8, 32], strides = [1, 1]} : vector<8x256xf32> to vector<8x32xf32>
    %24 = vector.extract_strided_slice %12 {offsets = [0, 160], sizes = [8, 32], strides = [1, 1]} : vector<8x256xf32> to vector<8x32xf32>
    %cst_6 = arith.constant dense<0.000000e+00> : vector<8x8xf32>
    %25 = tpu.matmul %13, %17, %cst_6 {dimension_numbers = #tpu.dot_dimension_numbers<[1], [1], [0], [0], [0, 0, 1, 0], [], []>} : vector<8x8xf32>, vector<8x8xf32>, vector<8x8xf32> -> vector<8x8xf32>
    %cst_7 = arith.constant 0xFF800000 : f32
    %26 = vector.broadcast %cst_7 : f32 to vector<8x8xf32>
    %27 = arith.select %8, %25, %26 : vector<8x8xi1>, vector<8x8xf32>
    %cst_8 = arith.constant dense<0xFF800000> : vector<8xf32>
    %28 = vector.multi_reduction <maximumf>, %27, %cst_8 [1] : vector<8x8xf32> to vector<8xf32>
    %29 = vector.shape_cast %28 : vector<8xf32> to vector<8x1xf32>
    %30 = vector.broadcast %29 : vector<8x1xf32> to vector<8x8xf32>
    %31 = arith.subf %27, %30 : vector<8x8xf32>
    %32 = math.exp %31 : vector<8x8xf32>
    %cst_9 = arith.constant dense<0.000000e+00> : vector<8xf32>
    %33 = vector.multi_reduction <add>, %32, %cst_9 [1] : vector<8x8xf32> to vector<8xf32>
    %34 = vector.shape_cast %33 : vector<8xf32> to vector<8x1xf32>
    %35 = tpu.reciprocal %34 {approx = true} : vector<8x1xf32> -> vector<8x1xf32>
    %36 = vector.broadcast %35 : vector<8x1xf32> to vector<8x8xf32>
    %37 = arith.mulf %32, %36 : vector<8x8xf32>
    %cst_10 = arith.constant dense<0.000000e+00> : vector<8x32xf32>
    %38 = tpu.matmul %37, %21, %cst_10 {dimension_numbers = #tpu.dot_dimension_numbers<[1], [0], [0], [1], [0, 0, 1, 1], [], []>} : vector<8x8xf32>, vector<8x32xf32>, vector<8x32xf32> -> vector<8x32xf32>
    %39 = arith.addf %3, %38 : vector<8x32xf32>
    %cst_11 = arith.constant dense<0.000000e+00> : vector<8x8xf32>
    %40 = tpu.matmul %14, %18, %cst_11 {dimension_numbers = #tpu.dot_dimension_numbers<[1], [1], [0], [0], [0, 0, 1, 0], [], []>} : vector<8x8xf32>, vector<8x8xf32>, vector<8x8xf32> -> vector<8x8xf32>
    %cst_12 = arith.constant 0xFF800000 : f32
    %41 = vector.broadcast %cst_12 : f32 to vector<8x8xf32>
    %42 = arith.select %8, %40, %41 : vector<8x8xi1>, vector<8x8xf32>
    %cst_13 = arith.constant dense<0xFF800000> : vector<8xf32>
    %43 = vector.multi_reduction <maximumf>, %42, %cst_13 [1] : vector<8x8xf32> to vector<8xf32>
    %44 = vector.shape_cast %43 : vector<8xf32> to vector<8x1xf32>
    %45 = vector.broadcast %44 : vector<8x1xf32> to vector<8x8xf32>
    %46 = arith.subf %42, %45 : vector<8x8xf32>
    %47 = math.exp %46 : vector<8x8xf32>
    %cst_14 = arith.constant dense<0.000000e+00> : vector<8xf32>
    %48 = vector.multi_reduction <add>, %47, %cst_14 [1] : vector<8x8xf32> to vector<8xf32>
    %49 = vector.shape_cast %48 : vector<8xf32> to vector<8x1xf32>
    %50 = tpu.reciprocal %49 {approx = true} : vector<8x1xf32> -> vector<8x1xf32>
    %51 = vector.broadcast %50 : vector<8x1xf32> to vector<8x8xf32>
    %52 = arith.mulf %47, %51 : vector<8x8xf32>
    %cst_15 = arith.constant dense<0.000000e+00> : vector<8x32xf32>
    %53 = tpu.matmul %52, %22, %cst_15 {dimension_numbers = #tpu.dot_dimension_numbers<[1], [0], [0], [1], [0, 0, 1, 1], [], []>} : vector<8x8xf32>, vector<8x32xf32>, vector<8x32xf32> -> vector<8x32xf32>
    %54 = arith.addf %39, %53 : vector<8x32xf32>
    %cst_16 = arith.constant dense<0.000000e+00> : vector<8x8xf32>
    %55 = tpu.matmul %15, %19, %cst_16 {dimension_numbers = #tpu.dot_dimension_numbers<[1], [1], [0], [0], [0, 0, 1, 0], [], []>} : vector<8x8xf32>, vector<8x8xf32>, vector<8x8xf32> -> vector<8x8xf32>
    %cst_17 = arith.constant 0xFF800000 : f32
    %56 = vector.broadcast %cst_17 : f32 to vector<8x8xf32>
    %57 = arith.select %8, %55, %56 : vector<8x8xi1>, vector<8x8xf32>
    %cst_18 = arith.constant dense<0xFF800000> : vector<8xf32>
    %58 = vector.multi_reduction <maximumf>, %57, %cst_18 [1] : vector<8x8xf32> to vector<8xf32>
    %59 = vector.shape_cast %58 : vector<8xf32> to vector<8x1xf32>
    %60 = vector.broadcast %59 : vector<8x1xf32> to vector<8x8xf32>
    %61 = arith.subf %57, %60 : vector<8x8xf32>
    %62 = math.exp %61 : vector<8x8xf32>
    %cst_19 = arith.constant dense<0.000000e+00> : vector<8xf32>
    %63 = vector.multi_reduction <add>, %62, %cst_19 [1] : vector<8x8xf32> to vector<8xf32>
    %64 = vector.shape_cast %63 : vector<8xf32> to vector<8x1xf32>
    %65 = tpu.reciprocal %64 {approx = true} : vector<8x1xf32> -> vector<8x1xf32>
    %66 = vector.broadcast %65 : vector<8x1xf32> to vector<8x8xf32>
    %67 = arith.mulf %62, %66 : vector<8x8xf32>
    %cst_20 = arith.constant dense<0.000000e+00> : vector<8x32xf32>
    %68 = tpu.matmul %67, %23, %cst_20 {dimension_numbers = #tpu.dot_dimension_numbers<[1], [0], [0], [1], [0, 0, 1, 1], [], []>} : vector<8x8xf32>, vector<8x32xf32>, vector<8x32xf32> -> vector<8x32xf32>
    %69 = arith.addf %54, %68 : vector<8x32xf32>
    %cst_21 = arith.constant dense<0.000000e+00> : vector<8x8xf32>
    %70 = tpu.matmul %16, %20, %cst_21 {dimension_numbers = #tpu.dot_dimension_numbers<[1], [1], [0], [0], [0, 0, 1, 0], [], []>} : vector<8x8xf32>, vector<8x8xf32>, vector<8x8xf32> -> vector<8x8xf32>
    %cst_22 = arith.constant 0xFF800000 : f32
    %71 = vector.broadcast %cst_22 : f32 to vector<8x8xf32>
    %72 = arith.select %8, %70, %71 : vector<8x8xi1>, vector<8x8xf32>
    %cst_23 = arith.constant dense<0xFF800000> : vector<8xf32>
    %73 = vector.multi_reduction <maximumf>, %72, %cst_23 [1] : vector<8x8xf32> to vector<8xf32>
    %74 = vector.shape_cast %73 : vector<8xf32> to vector<8x1xf32>
    %75 = vector.broadcast %74 : vector<8x1xf32> to vector<8x8xf32>
    %76 = arith.subf %72, %75 : vector<8x8xf32>
    %77 = math.exp %76 : vector<8x8xf32>
    %cst_24 = arith.constant dense<0.000000e+00> : vector<8xf32>
    %78 = vector.multi_reduction <add>, %77, %cst_24 [1] : vector<8x8xf32> to vector<8xf32>
    %79 = vector.shape_cast %78 : vector<8xf32> to vector<8x1xf32>
    %80 = tpu.reciprocal %79 {approx = true} : vector<8x1xf32> -> vector<8x1xf32>
    %81 = vector.broadcast %80 : vector<8x1xf32> to vector<8x8xf32>
    %82 = arith.mulf %77, %81 : vector<8x8xf32>
    %cst_25 = arith.constant dense<0.000000e+00> : vector<8x32xf32>
    %83 = tpu.matmul %82, %24, %cst_25 {dimension_numbers = #tpu.dot_dimension_numbers<[1], [0], [0], [1], [0, 0, 1, 1], [], []>} : vector<8x8xf32>, vector<8x32xf32>, vector<8x32xf32> -> vector<8x32xf32>
    %84 = arith.addf %69, %83 : vector<8x32xf32>
    %85 = arith.index_cast %c0_i32_3 : i32 to index
    %c0_26 = arith.constant 0 : index
    %c0_27 = arith.constant 0 : index
    %86 = vector.load %arg4[%85, %c0_26, %c0_27] : memref<1x8x32xf32, #tpu.memory_space<vmem>>, vector<1x8x32xf32>
    %87 = vector.shape_cast %86 : vector<1x8x32xf32> to vector<8x32xf32>
    %88 = vector.shape_cast %84 : vector<8x32xf32> to vector<1x8x32xf32>
    tpu.vector_store %arg4[%85, %c0_26, %c0_27], %88 {strides = array<i32>} : memref<1x8x32xf32, #tpu.memory_space<vmem>>, vector<1x8x32xf32>,
    %c1_i32 = arith.constant 1 : i32
    return
  }
  func.func @transform_0(%arg0: i32) -> (i32, i32, i32) {
    %c0_i32 = arith.constant 0 : i32
    %c0_i32_0 = arith.constant 0 : i32
    %c0_i32_1 = arith.constant 0 : i32
    return %arg0, %c0_i32, %c0_i32_0 : i32, i32, i32
  }
  func.func @transform_1(%arg0: i32) -> (i32, i32) {
    %c0_i32 = arith.constant 0 : i32
    %c0_i32_0 = arith.constant 0 : i32
    %c0_i32_1 = arith.constant 0 : i32
    return %c0_i32, %c0_i32_0 : i32, i32
  }
  func.func @transform_2(%arg0: i32) -> (i32, i32) {
    %c0_i32 = arith.constant 0 : i32
    %c0_i32_0 = arith.constant 0 : i32
    %c0_i32_1 = arith.constant 0 : i32
    return %c0_i32, %c0_i32_0 : i32, i32
  }
  func.func @transform_3(%arg0: i32) -> (i32, i32, i32) {
    %c0_i32 = arith.constant 0 : i32
    %c0_i32_0 = arith.constant 0 : i32
    %c0_i32_1 = arith.constant 0 : i32
    return %arg0, %c0_i32, %c0_i32_0 : i32, i32, i32
  }
}

</mosaic_0001>

<bundles_post_ra>
// kernel: multi_head_attention.1
= control target key start
LH: loop header
LB: loop body
LE: loop exit
PB: predicated region body
PF: predicated region fallthrough
CT: control target
= control target key end

     0   :  { %8 = vsyncpa [#allocation3], 0  ;;  %s1431_s0 = inlined_call_operand.vmem [shape: f32[2,8,32], index: 0, kind: input, shape index: {}]   ;;  %s1432_s1 = inlined_call_operand.vmem [shape: f32[32,256], index: 1, kind: input, shape index: {}]   ;;  %s1433_s2 = inlined_call_operand.vmem [shape: f32[1,32], index: 2, kind: input, shape index: {}]   ;;  %s1434_s3 = inlined_call_operand.hbm [shape: f32[2,8,32], index: 3, kind: output, shape index: {}]  }
   0x1   :  { %10 = vsyncpa [#allocation3 + $0x1], 0  ;;  %s1242_s12 = smov 0   ;;  %s1244_s13 = smov 0  }
   0x2   :  { %s1246_s14 = smov 0   ;;  %s1248_s15 = smov 0  }
   0x3 LB: > { %s1263_s16 = sadd.s32 4294967295, %s1208_s15   ;;  %s1002_s17 = sadd.s32 4294967294, %s1208_s15   ;;  %s1208_s15 = sphi %s1248_s15, %s1440_s15   ;;  %s1204_s14 = sphi %s1246_s14, %s1439_s14   ;;  %s1200_s13 = sphi %s1244_s13, %s1438_s13   ;;  %s1196_s12 = sphi %s1242_s12, %s1437_s12  }
   0x4   : > { %s1267_s18 = sadd.s32 1, %s1208_s15   ;;  %s91_s19 = sadd.s32 1, %s1204_s14 }
   0x5   : > { %s88_s20 = ssub.s32 %s1208_s15, %s1267_s18  ;;  %p101_p0 = scmp.ne.s32.totalorder %s1204_s14, %s1200_s13 }
   0x6   : > { %p89_p1 = scmp.eq.s32.totalorder %s88_s20, 0  ;;  %p102_p2 = scmp.eq.s32.totalorder %s1263_s16, 1 }
   0x7   : > { %p107_p3 = scmp.ne.s32.totalorder %s1200_s13, %s1196_s12  ;;  %p108_p4 = scmp.eq.s32.totalorder %s1002_s17, 1 }
   0x8   : > { %s1278_s21 = scalar_select %p89_p1, %s1204_s14, %s91_s19  }
   0x9   : > { %p1280_p5 = por %p102_p2, %p101_p0  ;;  %p1284_p6 = por %p108_p4, %p107_p3 }
   0xa   : > { %p1005_p7 = scmp.ge.s32.totalorder %s1208_s15, 1  ;;  %p139_p8 = scmp.lt.s32.totalorder %s1208_s15, 3 }
   0xc   : > { %p140_p9 = pnand %p1005_p7, %p139_p8 }
   0xd   : > { %p162_p10 = scmp.lt.s32.totalorder (!%p140_p9), %s1263_s16, 1  ;;  %s1212_s27 = smov (!%p140_p9), 120  }
   0xe   : > { %143 = sbr.rel (%p140_p9) target bundleno = 1110 (0x456), region = 32  ;;  %s1213_s28 = smov (!%p140_p9), 96  }
   0xf   : > { %s1214_s29 = smov (!%p140_p9), 80   ;;  %s1215_s30 = smov (!%p140_p9), 88  }
  0x10   : > { %s1216_s4 = smov (!%p140_p9), 72   ;;  %s1217_s5 = smov (!%p140_p9), 112  }
  0x11   : > { %s1218_s6 = smov (!%p140_p9), 104   ;;  %s1220_s8 = smov (!%p140_p9), 64  }
  0x12   : > { %s159_s9 = sand.u32 (!%p140_p9), 1, %s1200_s13   ;;  %s1023_s19 = sshll.u32 (!%p140_p9), %s1263_s16, 7 }
  0x13   : > { %v173_v0 = vld [vmem:[%s1432_s1 + $0x38] sm:$0xff]  ;;  %v172_v1 = vld [vmem:[%s1432_s1 + $0x30] sm:$0xff]  ;;  %v171_v2 = vld [vmem:[%s1432_s1 + $0x28] sm:$0xff]  ;;  %v1210_v4 = vmov 0.0   ;;  %s163_s7 = scalar_select %p162_p10, %s1263_s16, 1  ;;  %vm187_vm0 = vcmask 261120   ;;  %v181_v18 = vlaneseq }
  0x14   : > { %215 = vmatprep.subr.mxu0 %v173_v0  ;;  %v170_v3 = vld [vmem:[%s1432_s1 + $0x20] sm:$0xff]  ;;  %255 = vmatprep.mubr.f32.mxu0 %v1210_v4  ;;  %v169_v5 = vld [vmem:[%s1432_s1 + $0x18] sm:$0xff]  ;;  %v168_v6 = vld [vmem:[%s1432_s1 + $0x10] sm:$0xff]  ;;  %vm1211_vm1 = vmmov 0   ;;  %vm265_vm2 = vcmask 64512   ;;  %s1221_s16 = smov [#allocation2]  }
  0x15   : > { %216 = vmatpush1.msra.mxu0 %v172_v1  ;;  %1042 = vmatprep.subr.mxu1 %v1210_v4  ;;  %v167_v7 = vld [vmem:[%s1432_s1 + $0x8] sm:$0xff]  ;;  %s1007_s17 = sshll.u32 %s163_s7, 3  ;;  %v166_v8 = vld [vmem:[%s1432_s1] sm:$0xff]  ;;  %v182_v19 = vshrl.u32 %v181_v18, 7  ;;  %v184_v20 = vand.u32 127, %v181_v18  ;;  %s1219_s7 = smov 32  }
  0x16   : > { %217 = vmatprep.subr.mxu0 %v171_v2  ;;  %s165_s26 = scalar_lea.vmem %s1431_s0, %s1007_s17  ;;  %1044 = vmatprep.mubr.msk.f32.mxu1 %vm1211_vm1, %v1210_v4  ;;  %s1006_s17 = sshll.u32 %s159_s9, 3 }
  0x17   : > { %218 = vmatpush1.msra.mxu0 %v170_v3  ;;  %v186_v9 = vld [vmem:[%s165_s26] sm:$0xff]  ;;  %vm185_vm3 = vcmp.ge.s32.totalorder %v182_v19, %v184_v20  ;;  %s161_s20 = scalar_lea.vmem [#allocation2], %s1006_s17 }
  0x18   : > { %219 = vmatprep.subr.mxu0 %v169_v5  ;;  %s943_s24 = sshll.u32 %s161_s20, 4  ;;  %s944_s24 = int_to_ptr.vmem [resolvable:$true] %s943_s24 }
  0x19   : > { %220 = vmatpush1.msra.mxu0 %v168_v6 }
  0x1a   : > { %221 = vmatprep.subr.mxu0 %v167_v7 }
  0x1b   : > { %222 = vmatpush1.msra.mxu0 %v166_v8 }
  0x1c   : > { %1009 = vmatmul.mubr.msk.f32.vlgmr.msra.gmra.mxu0 %vm187_vm0, %v186_v9  ;;  %1052 = vmatprep.subr.mxu0 %v1210_v4 }
  0x1d   : > { %1054 = vmatprep.mubr.msk.f32.mxu0 %vm1211_vm1, %v1210_v4 }
  0xdc   : > { %v1327_v10 = vpop.f32.mrf.mxu0 }
  0xdd   : > { %429 = vrot.lane.b32.xlu1 %v1327_v10, %s1212_s27  ;;  %263 = vrot.lane.b32.xlu0 %v1327_v10, %s1213_s28  ;;  %s1395_s27 = scalar_lea.hbm %s1434_s3, %s1023_s19 }
  0xde   : > { %v1356_v23 = vpop.f32.mrf.mxu0 }
  0xe1   : > { %598 = vrot.lane.b32.xlu1 %v1327_v10, %s1214_s29  ;;  %431 = vrot.lane.b32.xlu0 %v1327_v10, %s1215_s30  ;;  %s1148_s29 = scalar_lea.vmem %s944_s24, 128  ;;  %s1152_s30 = sshll.u32 %s1221_s16, 4  ;;  %s1153_s30 = int_to_ptr.vmem [resolvable:$false] %s1152_s30 }
  0xe2   : > { %p1149_p11 = scmp.ne.s32.totalorder %s944_s24, %s1148_s29  ;;  %p1155_p0 = scmp.lt.s32.totalorder %s944_s24, %s1153_s30 }
  0xe4   : > { %p1150_p12 = pnand %p1149_p11, %p1280_p5 }
  0xe5   : > { %762 = vrot.lane.b32.xlu1 %v1327_v10, %s1216_s4  ;;  %596 = vrot.lane.b32.xlu0 %v1327_v10, %s1217_s5  ;;  %s1154_s4 = scalar_lea.vmem %s1153_s30, 256 }
  0xe6   : > { %p1151_p13 = pneg %p1150_p12  ;;  %p1156_p1 = scmp.lt.s32.totalorder %s1154_s4, %s1148_s29 }
  0xe8   : > { %p1157_p2 = por %p1156_p1, %p1155_p0 }
  0xe9   : > { %760 = vrot.lane.b32.xlu0 %v1327_v10, %s1218_s6 }
  0xea   : > { %p1158_p3 = pnand %p1157_p2, %p1151_p13 }
 0x14f   : > { %v430_v11 = vpop.permute.xlu1 %429  ;;  %v264_v12 = vpop.permute.xlu0 %263 }
 0x150   : > { %1043 = vmatpush3.xpose.msk.msra.mxu1 %vm265_vm2, %v264_v12 }
 0x151   : > { %1047 = vmatprep.subr.mxu1 %v1210_v4 }
 0x153   : > { %1045 = vmatmul.mubr.msk.f32.vlgmr.msra.gmra.mxu1 %vm265_vm2, %v1327_v10  ;;  %v432_v13 = vpop.permute.xlu0 %431  ;;  %v599_v14 = vpop.permute.xlu1 %598 }
 0x154   : > { %1053 = vmatpush3.xpose.msk.msra.mxu0 %vm265_vm2, %v432_v13  ;;  %1049 = vmatprep.mubr.msk.f32.mxu1 %vm1211_vm1, %v1210_v4 }
 0x155   : > { %1062 = vmatprep.subr.mxu0 %v1210_v4 }
 0x157   : > { %1055 = vmatmul.mubr.msk.f32.vlgmr.msra.gmra.mxu0 %vm265_vm2, %v430_v11  ;;  %v597_v15 = vpop.permute.xlu0 %596  ;;  %v763_v16 = vpop.permute.xlu1 %762 }
 0x158   : > { %1063 = vmatpush3.xpose.msk.msra.mxu0 %vm265_vm2, %v599_v14  ;;  %1064 = vmatprep.mubr.msk.f32.mxu0 %vm1211_vm1, %v1210_v4 }
 0x159   : > { %1072 = vmatprep.subr.mxu0 %v1210_v4 }
 0x15b   : > { %1065 = vmatmul.mubr.msk.f32.vlgmr.msra.gmra.mxu0 %vm265_vm2, %v597_v15  ;;  %v761_v17 = vpop.permute.xlu0 %760 }
 0x15c   : > { %1073 = vmatpush3.xpose.msk.msra.mxu0 %vm265_vm2, %v763_v16  ;;  %1074 = vmatprep.mubr.msk.f32.mxu0 %vm1211_vm1, %v1210_v4 }
 0x15f   : > { %1075 = vmatmul.mubr.msk.f32.vlgmr.msra.gmra.mxu0 %vm265_vm2, %v761_v17 }
 0x213   : > { %v336_v21 = vpop.f32.mrf.mxu1 }
 0x214   : > { %v340_v22 = vsel %vm185_vm3, %v336_v21, -inf }
 0x215   : > { %v1046_v24 = vpop.f32.mrf.mxu1  ;;  %v341_v25 = vsel %vm265_vm2, %v340_v22, -inf }
 0x216   : > { %342 = vmax.xlane.f32.xlu1 %v341_v25 }
 0x217   : > { %v503_v26 = vpop.f32.mrf.mxu0 }
 0x218   : > { %v507_v27 = vsel %vm185_vm3, %v503_v26, -inf }
 0x219   : > { %v1056_v28 = vpop.f32.mrf.mxu0  ;;  %v508_v29 = vsel %vm265_vm2, %v507_v27, -inf }
 0x21a   : > { %509 = vmax.xlane.f32.xlu0 %v508_v29 }
 0x21b   : > { %v670_v30 = vpop.f32.mrf.mxu0 }
 0x21c   : > { %v674_v31 = vsel %vm185_vm3, %v670_v30, -inf }
 0x21d   : > { %v1066_v32 = vpop.f32.mrf.mxu0  ;;  %v675_v33 = vsel %vm265_vm2, %v674_v31, -inf }
 0x21e   : > { %676 = vmax.xlane.f32.xlu0 %v675_v33 }
 0x21f   : > { %v834_v34 = vpop.f32.mrf.mxu0 }
 0x220   : > { %v838_v35 = vsel %vm185_vm3, %v834_v34, -inf }
 0x221   : > { %v1076_v36 = vpop.f32.mrf.mxu0  ;;  %v839_v37 = vsel %vm265_vm2, %v838_v35, -inf }
 0x222   : > { %840 = vmax.xlane.f32.xlu1 %v839_v37 }
 0x29f   : > { %v343_v38 = vpop.xlane.xlu1 %342 }
 0x2a0   : > { %v344_v39 = vsub.f32 %v340_v22, %v343_v38 }
 0x2a2   : > { %v345_v40 = vmul.f32 1.442695, %v344_v39 }
 0x2a3   : > { %v510_v41 = vpop.xlane.xlu0 %509 }
 0x2a4   : > { %1132 = vpow2.f32 %v345_v40  ;;  %v511_v42 = vsub.f32 %v507_v27, %v510_v41 }
 0x2a6   : > { %v512_v43 = vmul.f32 1.442695, %v511_v42 }
 0x2a7   : > { %v677_v44 = vpop.xlane.xlu0 %676 }
 0x2a8   : > { %1134 = vpow2.f32 %v512_v43  ;;  %v678_v45 = vsub.f32 %v674_v31, %v677_v44 }
 0x2aa   : > { %v679_v46 = vmul.f32 1.442695, %v678_v45 }
 0x2ab   : > { %v841_v53 = vpop.xlane.xlu1 %840 }
 0x2ac   : > { %1136 = vpow2.f32 %v679_v46  ;;  %v842_v54 = vsub.f32 %v838_v35, %v841_v53 }
 0x2ae   : > { %v843_v55 = vmul.f32 1.442695, %v842_v54 }
 0x2b0   : > { %1138 = vpow2.f32 %v843_v55 }
 0x2b1   : > { %v1133_v47 = vpop.eup %1132 }
 0x2b2   : > { %v347_v48 = vsel %vm265_vm2, %v1133_v47, 0.0 }
 0x2b3   : > { %348 = vadd.xlane.f32.xlu0 %v347_v48 }
 0x2b5   : > { %v1135_v49 = vpop.eup %1134 }
 0x2b6   : > { %v514_v50 = vsel %vm265_vm2, %v1135_v49, 0.0 }
 0x2b7   : > { %515 = vadd.xlane.f32.xlu1 %v514_v50 }
 0x2b9   : > { %v1137_v51 = vpop.eup %1136 }
 0x2ba   : > { %v681_v52 = vsel %vm265_vm2, %v1137_v51, 0.0 }
 0x2bb   : > { %682 = vadd.xlane.f32.xlu0 %v681_v52 }
 0x2bd   : > { %v1139_v56 = vpop.eup %1138 }
 0x2be   : > { %v845_v57 = vsel %vm265_vm2, %v1139_v56, 0.0 }
 0x2c8   : > { %519 = vrot.lane.b32.xlu1 %v1327_v10, %s1219_s7 }
 0x2d1   : > { %352 = vrot.lane.b32.xlu0 %v1327_v10, %s1220_s8 }
 0x2ec   : > { %846 = vadd.xlane.f32.xlu1 %v845_v57 }
 0x2fd   : > { %851 = vrot.lane.b32.xlu1 %v1356_v23, %s1213_s28  ;;  %s930_s28 = scalar_lea.sflag [#allocation3], %s159_s9 }
 0x33c   : > { %v349_v58 = vpop.xlane.xlu0 %348 }
 0x33d   : > { %1140 = vrcp.f32 %v349_v58 }
 0x340   : > { %v516_v59 = vpop.xlane.xlu1 %515 }
 0x341   : > { %1142 = vrcp.f32 %v516_v59 }
 0x344   : > { %v683_v60 = vpop.xlane.xlu0 %682  ;;  %v520_v0 = vpop.permute.xlu1 %519 }
 0x345   : > { %1144 = vrcp.f32 %v683_v60 }
 0x348   : > { %v353_v61 = vpop.permute.xlu0 %352 }
 0x349   : > { %1048 = vmatpush3.msra.mxu1 %v353_v61 }
 0x34a   : > { %v1141_v62 = vpop.eup %1140  ;;  %1057 = vmatprep.subr.mxu1 %v1210_v4 }
 0x34b   : > { %v351_v63 = vmul.f32 %v1141_v62, %v1133_v47 }
 0x34d   : > { %1050 = vmatmul.mubr.msk.f32.vlgmr.msra.gmra.mxu1 %vm265_vm2, %v351_v63 }
 0x34e   : > { %v1143_v1 = vpop.eup %1142  ;;  %1058 = vmatpush3.msra.mxu1 %v520_v0  ;;  %1059 = vmatprep.mubr.msk.f32.mxu1 %vm1211_vm1, %v1210_v4 }
 0x34f   : > { %1067 = vmatprep.subr.mxu1 %v1210_v4  ;;  %v518_v2 = vmul.f32 %v1143_v1, %v1135_v49 }
 0x351   : > { %1060 = vmatmul.mubr.msk.f32.vlgmr.msra.gmra.mxu1 %vm265_vm2, %v518_v2 }
 0x352   : > { %v1145_v3 = vpop.eup %1144  ;;  %1068 = vmatpush3.msra.mxu1 %v1356_v23  ;;  %1069 = vmatprep.mubr.msk.f32.mxu1 %vm1211_vm1, %v1210_v4 }
 0x353   : > { %v685_v5 = vmul.f32 %v1145_v3, %v1137_v51  ;;  %1077 = vmatprep.subr.mxu1 %v1210_v4 }
 0x355   : > { %1070 = vmatmul.mubr.msk.f32.vlgmr.msra.gmra.mxu1 %vm265_vm2, %v685_v5 }
 0x356   : > { %1079 = vmatprep.mubr.msk.f32.mxu1 %vm1211_vm1, %v1210_v4  ;;  %v1008_v4 = vld [vmem:[%s1433_s2] ss:$0 sm:$0xff] }
 0x375   : > { %v847_v6 = vpop.xlane.xlu1 %846 }
 0x376   : > { %1146 = vrcp.f32 %v847_v6 }
 0x379   : > { %v852_v7 = vpop.permute.xlu1 %851 }
 0x37a   : > { %1078 = vmatpush3.msra.mxu1 %v852_v7 }
 0x383   : > { %v1147_v8 = vpop.eup %1146 }
 0x384   : > { %v849_v9 = vmul.f32 %v1147_v8, %v1139_v56 }
 0x386   : > { %1080 = vmatmul.mubr.msk.f32.vlgmr.msra.gmra.mxu1 %vm265_vm2, %v849_v9 }
 0x40d   : > { %v424_v10 = vpop.f32.mrf.mxu1 }
 0x40e   : > { %v428_v16 = vadd.f32 %v1008_v4, %v424_v10 }
 0x40f   : > { %v1051_v11 = vpop.f32.mrf.mxu1 }
 0x411   : > { %v591_v12 = vpop.f32.mrf.mxu1 }
 0x412   : > { %v595_v17 = vadd.f32 %v591_v12, %v428_v16 }
 0x413   : > { %v1061_v13 = vpop.f32.mrf.mxu1 }
 0x415   : > { %v755_v14 = vpop.f32.mrf.mxu1 }
 0x416   : > { %v759_v18 = vadd.f32 %v755_v14, %v595_v17 }
 0x417   : > { %v1071_v15 = vpop.f32.mrf.mxu1 }
 0x446   : > { %v923_v19 = vpop.f32.mrf.mxu1 }
 0x447   : > { %v927_v20 = vadd.f32 %v923_v19, %v759_v18 }
 0x448   : > { %v1081_v21 = vpop.f32.mrf.mxu1 }
 0x449   : > { %928 = vst.msk [vmem:[%s161_s20] sm:$0xff] %vm187_vm0, %v927_v20 }
 0x44a   : > { %1161 = shalt.err (!%p1158_p3)
}
 0x44b   : > { %s1162_s5 = scalar_lea.hbm %s1395_s27, 128  ;;  %s1166_s8 = scalar_lea.hbm %s1434_s3, 256 }
 0x44c   : > { %p1163_p4 = scmp.ne.s32.totalorder %s1395_s27, %s1162_s5  ;;  %p1167_p9 = scmp.lt.s32.totalorder %s1395_s27, %s1434_s3 }
 0x44d   : > { %p1168_p10 = scmp.lt.s32.totalorder %s1166_s8, %s1162_s5 }
 0x44e   : > { %p1164_p7 = pnand %p1163_p4, %p1280_p5 }
 0x44f   : > { %p1169_p11 = por %p1168_p10, %p1167_p9 }
 0x450   : > { %p1165_p8 = pneg %p1164_p7 }
 0x452   : > { %p1170_p12 = pnand %p1169_p11, %p1165_p8 }
 0x454   : > { %1173 = shalt.err (!%p1170_p12)
}
 0x455   : > { %1082 = dma.vmem_to_hbm [thread:$0]  (%p1280_p5), %s944_s24, 128, %s1395_s27, %s930_s28  }
 0x456 PF: > { %p1088_p13 = scmp.ge.s32.totalorder %s1208_s15, 2  ;;  %s955_s11 = sand.u32 1, %s1196_s12  }
 0x457   : > { %s956_s17 = scalar_lea.sflag [#allocation3], %s955_s11 }
 0x458   : > { %p1085_p0 = pnand %p1088_p13, %p1284_p6 }
 0x45a   : > { %p1086_p1 = pneg %p1085_p0 }
 0x45c   : > { %1191 = dma.done.wait (%p1086_p1), %s956_s17, 128  }
 0x45d   : > { %1193 = vsyncadd (%p1086_p1), %s956_s17, 4294967168  ;;  %p13_p2 = scmp.ge.s32.totalorder %s1267_s18, 4   ;;  %s1437_s12 = smov %s1200_s13 }
 0x45e   : > { %s1438_s13 = smov %s1204_s14  ;;  %s1439_s14 = smov %s1278_s21 }
 0x45f   : > { %s1440_s15 = smov %s1267_s18  ;;  %15 = sbr.rel (!%p13_p2) target bundleno = 3 (0x3), region = 67 }
 0x464   :  { %961 = vsyncpa [#allocation3], 1 }
 0x465   :  { %963 = vsyncpa [#allocation3 + $0x1], 1 }

</bundles_post_ra>
